<compile_context>
chip_gen: v7x
topology: tpu7x:2x2x1
jax: 0.10.0
libtpu: 0.0.40
codegen_flags: <defaults>
</compile_context>

<pallas_src>
import functools
import math

import jax
import jax.numpy as jnp
from jax.experimental import pallas as pl
from jax.experimental.pallas import tpu as pltpu


def _round_up(x: int, m: int) -> int:
    return ((x + m - 1) // m) * m


# ----------------------------------------------------------------------------
# Linear projection (no bias):  Y[n, d_out] = X[n, d_in] @ Wt[d_in, d_out]
# ----------------------------------------------------------------------------
def _linear_kernel(x_ref, w_ref, o_ref):
    o_ref[...] = jnp.dot(
        x_ref[...], w_ref[...], preferred_element_type=jnp.float32
    ).astype(o_ref.dtype)


def linear_nobias(x2, w_t, *, tm=256):
    """x2: (n, d_in); w_t: (d_in, d_out), weight stored pre-transposed."""
    n, d_in = x2.shape
    d_out = w_t.shape[1]

    # Large row tile by default; clamp to the (8-aligned) row count and pad so
    # any n works (no "n % tm == 0" restriction).
    tm_eff = min(tm, _round_up(n, 8))
    n_pad = _round_up(n, tm_eff)
    if n_pad != n:
        x2 = jnp.pad(x2, ((0, n_pad - n), (0, 0)))

    out = pl.pallas_call(
        _linear_kernel,
        out_shape=jax.ShapeDtypeStruct((n_pad, d_out), x2.dtype),
        grid_spec=pltpu.PrefetchScalarGridSpec(
            num_scalar_prefetch=0,
            grid=(n_pad // tm_eff,),
            in_specs=[
                pl.BlockSpec((tm_eff, d_in), lambda i: (i, 0)),   # row tile
                pl.BlockSpec((d_in, d_out), lambda i: (0, 0)),    # full weight
            ],
            out_specs=pl.BlockSpec((tm_eff, d_out), lambda i: (i, 0)),
        ),
        compiler_params=pltpu.CompilerParams(
            dimension_semantics=("parallel",),
            vmem_limit_bytes=64 * 1024 * 1024,
        ),
    )(x2, w_t)
    return out[:n]


# ----------------------------------------------------------------------------
# Scaled dot-product attention: one (batch * head) slice per grid step.
# ----------------------------------------------------------------------------
def _attention_kernel(vl_ref, q_ref, k_ref, v_ref, o_ref, *, scale):
    q = q_ref[0]                       # (Tq, dh)
    k = k_ref[0]                       # (Tk, dh)
    v = v_ref[0]                       # (Tk, dh)

    # scores = Q @ K^T / sqrt(dh), contracted on the head dim (no explicit .T)
    s = jax.lax.dot_general(
        q, k, (((1,), (1,)), ((), ())), preferred_element_type=jnp.float32
    ) * scale                          # (Tq, Tk)

    vl = vl_ref[pl.program_id(0)]      # scalar valid length for this (b, h)
    col = jax.lax.broadcasted_iota(jnp.int32, s.shape, 1)
    s = jnp.where(col < vl, s, -1e6)   # same -1000000.0 trick as the torch code

    s = s - jnp.max(s, axis=-1, keepdims=True)
    p = jnp.exp(s)
    p = p / jnp.sum(p, axis=-1, keepdims=True)
    # TODO(synk): dropout on attention weights is omitted (eval-mode identity).

    o_ref[0] = jnp.dot(
        p.astype(v.dtype), v, preferred_element_type=jnp.float32
    ).astype(o_ref.dtype)


def _dot_product_attention(qh, kh, vh, valid_lens_rep, *, scale):
    """qh: (BH, Tq, dh); kh, vh: (BH, Tk, dh); valid_lens_rep: (BH,) int32."""
    BH, Tq, dh = qh.shape
    Tk = kh.shape[1]

    return pl.pallas_call(
        functools.partial(_attention_kernel, scale=scale),
        out_shape=jax.ShapeDtypeStruct((BH, Tq, dh), qh.dtype),
        grid_spec=pltpu.PrefetchScalarGridSpec(
            num_scalar_prefetch=1,                      # valid_lens -> SMEM
            grid=(BH,),
            in_specs=[
                pl.BlockSpec((1, Tq, dh), lambda i, vl: (i, 0, 0)),
                pl.BlockSpec((1, Tk, dh), lambda i, vl: (i, 0, 0)),
                pl.BlockSpec((1, Tk, dh), lambda i, vl: (i, 0, 0)),
            ],
            out_specs=pl.BlockSpec((1, Tq, dh), lambda i, vl: (i, 0, 0)),
        ),
        compiler_params=pltpu.CompilerParams(
            dimension_semantics=("parallel",),
        ),
    )(valid_lens_rep, qh, kh, vh)


# ----------------------------------------------------------------------------
# Full multi-head attention forward.
# ----------------------------------------------------------------------------
def multi_head_attention(queries, keys, values, wq_t, wk_t, wv_t, wo_t,
                         valid_lens, num_heads):
    """Weights are pre-transposed to (in_features, num_hiddens).
    valid_lens: (batch,) int array or None."""
    B, Tq, dq = queries.shape
    _, Tk, dk = keys.shape
    dv = values.shape[-1]
    H = wq_t.shape[1]
    dh = H // num_heads

    q = linear_nobias(queries.reshape(-1, dq), wq_t).reshape(B, Tq, H)
    k = linear_nobias(keys.reshape(-1, dk), wk_t).reshape(B, Tk, H)
    v = linear_nobias(values.reshape(-1, dv), wv_t).reshape(B, Tk, H)

    def split_heads(x, T):              # transpose_qkv
        return (x.reshape(B, T, num_heads, dh)
                 .transpose(0, 2, 1, 3)
                 .reshape(B * num_heads, T, dh))

    qh, kh, vh = split_heads(q, Tq), split_heads(k, Tk), split_heads(v, Tk)

    if valid_lens is None:
        vl_rep = jnp.full((B * num_heads,), Tk, dtype=jnp.int32)
    else:
        # TODO(synk): 2-D (per-query) valid_lens not supported, only (batch,).
        vl_rep = jnp.repeat(valid_lens.astype(jnp.int32), num_heads)

    o = _dot_product_attention(qh, kh, vh, vl_rep, scale=1.0 / math.sqrt(dh))

    # transpose_output
    o = (o.reshape(B, num_heads, Tq, dh)
          .transpose(0, 2, 1, 3)
          .reshape(B, Tq, H))
    return linear_nobias(o.reshape(-1, H), wo_t).reshape(B, Tq, H)


# ----------------------------------------------------------------------------
# Plain-JAX reference (same math as the PyTorch module).
# ----------------------------------------------------------------------------
def _reference_mha(queries, keys, values, wq_t, wk_t, wv_t, wo_t,
                   valid_lens, num_heads):
    B, Tq, _ = queries.shape
    Tk = keys.shape[1]
    H = wq_t.shape[1]
    dh = H // num_heads

    q, k, v = queries @ wq_t, keys @ wk_t, values @ wv_t

    def split(x, T):
        return (x.reshape(B, T, num_heads, dh)
                 .transpose(0, 2, 1, 3)
                 .reshape(B * num_heads, T, dh))

    qh, kh, vh = split(q, Tq), split(k, Tk), split(v, Tk)
    s = jnp.einsum("bqd,bkd->bqk", qh, kh) / math.sqrt(dh)
    if valid_lens is not None:
        vl = jnp.repeat(valid_lens.astype(jnp.int32), num_heads)
        mask = jnp.arange(Tk)[None, None, :] < vl[:, None, None]
        s = jnp.where(mask, s, -1e6)
    p = jax.nn.softmax(s, axis=-1)
    o = jnp.einsum("bqk,bkd->bqd", p, vh)
    o = (o.reshape(B, num_heads, Tq, dh)
          .transpose(0, 2, 1, 3)
          .reshape(B, Tq, H))
    return o @ wo_t


if __name__ == "__main__":
    # Small shapes consistent with the module's forward.
    batch, seq = 2, 8
    qsize = ksize = vsize = 32
    num_hiddens, num_heads = 32, 4

    key = jax.random.PRNGKey(0)
    kq, kk, kv, kwq, kwk, kwv, kwo = jax.random.split(key, 7)

    queries = jax.random.normal(kq, (batch, seq, qsize), dtype=jnp.float32)
    keys = jax.random.normal(kk, (batch, seq, ksize), dtype=jnp.float32)
    values = jax.random.normal(kv, (batch, seq, vsize), dtype=jnp.float32)

    # Weights stored pre-transposed (in_features, num_hiddens) — the torch
    # (out, in) -> (in, out) transpose is hoisted out of the per-call path.
    wq_t = jax.random.normal(kwq, (qsize, num_hiddens), dtype=jnp.float32) * 0.1
    wk_t = jax.random.normal(kwk, (ksize, num_hiddens), dtype=jnp.float32) * 0.1
    wv_t = jax.random.normal(kwv, (vsize, num_hiddens), dtype=jnp.float32) * 0.1
    wo_t = jax.random.normal(kwo, (num_hiddens, num_hiddens), dtype=jnp.float32) * 0.1

    valid_lens = jnp.array([3, 5], dtype=jnp.int32)

    y_masked = multi_head_attention(queries, keys, values,
                                    wq_t, wk_t, wv_t, wo_t,
                                    valid_lens, num_heads)
    y_full = multi_head_attention(queries, keys, values,
                                  wq_t, wk_t, wv_t, wo_t,
                                  None, num_heads)
    y_masked, y_full = jax.block_until_ready((y_masked, y_full))

    ref_masked = _reference_mha(queries, keys, values,
                                wq_t, wk_t, wv_t, wo_t, valid_lens, num_heads)
    ref_full = _reference_mha(queries, keys, values,
                              wq_t, wk_t, wv_t, wo_t, None, num_heads)

    assert y_masked.shape == (batch, seq, num_hiddens)
    assert y_full.shape == (batch, seq, num_hiddens)
    assert jnp.allclose(y_masked, ref_masked, atol=1e-4, rtol=1e-4)
    assert jnp.allclose(y_full, ref_full, atol=1e-4, rtol=1e-4)

    print("KERNEL_OK")
</pallas_src>

<mosaic_0001>
module attributes {stable_mosaic.version = 11 : i64} {
  func.func @_linear_kernel(%arg0: i32, %arg1: memref<16x32xf32, #tpu.memory_space<vmem>>, %arg2: memref<32x32xf32, #tpu.memory_space<vmem>>, %arg3: memref<16x32xf32, #tpu.memory_space<vmem>>) attributes {dimension_semantics = [#tpu.dimension_semantics<parallel>], iteration_bounds = array<i64: 1>, scalar_prefetch = 0 : i64, scratch_operands = 0 : i64, tpu.core_type = #tpu.core_type<tc>, window_params = [{transform_indices = @transform_0, window_bounds = array<i64: 16, 32>}, {pipeline_mode = #tpu.pipeline_mode<synchronous>, transform_indices = @transform_1, window_bounds = array<i64: 32, 32>}, {transform_indices = @transform_2, window_bounds = array<i64: 16, 32>}]} {
    %c0 = arith.constant 0 : index
    %c0_0 = arith.constant 0 : index
    %0 = vector.load %arg1[%c0, %c0_0] : memref<16x32xf32, #tpu.memory_space<vmem>>, vector<16x32xf32>
    %c0_1 = arith.constant 0 : index
    %c0_2 = arith.constant 0 : index
    %1 = vector.load %arg2[%c0_1, %c0_2] : memref<32x32xf32, #tpu.memory_space<vmem>>, vector<32x32xf32>
    %cst = arith.constant dense<0.000000e+00> : vector<16x32xf32>
    %2 = tpu.matmul %0, %1, %cst {dimension_numbers = #tpu.dot_dimension_numbers<[1], [0], [0], [1], [0, 0, 1, 1], [], []>} : vector<16x32xf32>, vector<32x32xf32>, vector<16x32xf32> -> vector<16x32xf32>
    %c0_3 = arith.constant 0 : index
    %c0_4 = arith.constant 0 : index
    %3 = vector.load %arg3[%c0_3, %c0_4] : memref<16x32xf32, #tpu.memory_space<vmem>>, vector<16x32xf32>
    tpu.vector_store %arg3[%c0_3, %c0_4], %2 {strides = array<i32>} : memref<16x32xf32, #tpu.memory_space<vmem>>, vector<16x32xf32>,
    return
  }
  func.func @transform_0(%arg0: i32) -> (i32, i32) {
    %c0_i32 = arith.constant 0 : i32
    %c0_i32_0 = arith.constant 0 : i32
    return %arg0, %c0_i32 : i32, i32
  }
  func.func @transform_1(%arg0: i32) -> (i32, i32) {
    %c0_i32 = arith.constant 0 : i32
    %c0_i32_0 = arith.constant 0 : i32
    %c0_i32_1 = arith.constant 0 : i32
    return %c0_i32, %c0_i32_0 : i32, i32
  }
  func.func @transform_2(%arg0: i32) -> (i32, i32) {
    %c0_i32 = arith.constant 0 : i32
    %c0_i32_0 = arith.constant 0 : i32
    return %arg0, %c0_i32 : i32, i32
  }
}

</mosaic_0001>

<bundles_post_ra>
// kernel: tpu_custom_call.1
= control target key start
LH: loop header
LB: loop body
LE: loop exit
PB: predicated region body
PF: predicated region fallthrough
CT: control target
= control target key end

     0   :  { %7 = vsyncpa [#allocation3], 0  ;;  %s321_s0 = inlined_call_operand.hbm [shape: f32[16,32], index: 0, kind: input, shape index: {}]   ;;  %s322_s1 = inlined_call_operand.hbm [shape: f32[32,32], index: 1, kind: input, shape index: {}]   ;;  %s323_s2 = inlined_call_operand.hbm [shape: f32[16,32], index: 2, kind: output, shape index: {}]  }
   0x1   :  { %8 = vsyncpa [#allocation6], 0 }
   0x2   :  { %9 = vsyncpa [#allocation4], 0  ;;  %s252_s9 = smov [#allocation2]   ;;  %s180_s13 = scalar_lea.hbm %s321_s0, 256 }
   0x3   :  { %s15_s10 = sshll.u32 %s252_s9, 4  ;;  %p181_p0 = scmp.ne.s32.totalorder %s321_s0, %s180_s13  ;;  %s16_s10 = int_to_ptr.vmem [resolvable:$true] %s15_s10 }
   0x4   :  { %p184_p1 = scmp.lt.u32.totalorder %s180_s13, %s321_s0 }
   0x6   :  { %p186_p2 = pnand %p184_p1, %p181_p0 }
   0x8   :  { %189 = shalt.err (!%p186_p2)
}
   0x9   :  { %s190_s18 = scalar_lea.vmem %s16_s10, 256  ;;  %p195_p4 = scmp.lt.s32.totalorder %s16_s10, %s16_s10 }
   0xa   :  { %p191_p3 = scmp.ne.s32.totalorder %s16_s10, %s190_s18  ;;  %p196_p5 = scmp.lt.s32.totalorder %s190_s18, %s190_s18 }
   0xc   :  { %p197_p6 = por %p196_p5, %p195_p4 }
   0xe   :  { %p198_p7 = pnand %p197_p6, %p191_p3 }
  0x10   :  { %201 = shalt.err (!%p198_p7)
}
  0x11   :  { %s253_s19 = smov 128   ;;  %s254_s20 = smov 8  }
  0x12   :  { %21 = dma.hbm_to_vmem [thread:$0]  %s321_s0, 256, %s16_s10, [#allocation3], %s253_s19, %s253_s19, %s254_s20  }
  0x13   :  { %s255_s23 = smov [#allocation5]   ;;  %s202_s27 = scalar_lea.hbm %s322_s1, 512 }
  0x14   :  { %s27_s24 = sshll.u32 %s255_s23, 4  ;;  %p203_p8 = scmp.ne.s32.totalorder %s322_s1, %s202_s27  ;;  %s28_s24 = int_to_ptr.vmem [resolvable:$true] %s27_s24 }
  0x15   :  { %p206_p9 = scmp.lt.u32.totalorder %s202_s27, %s322_s1 }
  0x17   :  { %p208_p10 = pnand %p206_p9, %p203_p8 }
  0x19   :  { %211 = shalt.err (!%p208_p10)
}
  0x1a   :  { %s212_s4 = scalar_lea.vmem %s28_s24, 512  ;;  %p217_p12 = scmp.lt.s32.totalorder %s28_s24, %s28_s24 }
  0x1b   :  { %p213_p11 = scmp.ne.s32.totalorder %s28_s24, %s212_s4  ;;  %p218_p13 = scmp.lt.s32.totalorder %s212_s4, %s212_s4 }
  0x1d   :  { %p219_p0 = por %p218_p13, %p217_p12 }
  0x1f   :  { %p220_p1 = pnand %p219_p0, %p213_p11 }
  0x21   :  { %223 = shalt.err (!%p220_p1)
}
  0x22   :  { %33 = dma.hbm_to_vmem [thread:$0]  %s322_s1, 512, %s28_s24, [#allocation6], %s253_s19, %s253_s19, %s254_s20  }
  0x23   :  { %246 = dma.done.wait [#allocation3], 256  }
  0x24   :  { %247 = vsyncadd [#allocation3], 4294967040 }
  0x25   :  { %248 = dma.done.wait [#allocation6], 512  }
  0x26   :  { %249 = vsyncadd [#allocation6], 4294966784  ;;  %vm46_vm0 = vcmask 261120   ;;  %v42_v0 = vld [vmem:[#allocation5] sm:$0xff]  ;;  %v43_v1 = vld [vmem:[#allocation5 + $0x8] sm:$0xff]  ;;  %s256_s1 = smov [#allocation7]  }
  0x27   :  { %v44_v2 = vld [vmem:[#allocation5 + $0x10] sm:$0xff]  ;;  %v167_v3 = vpack.c.bf16 %v43_v1, %v42_v0  ;;  %v45_v4 = vld [vmem:[#allocation5 + $0x18] sm:$0xff]  ;;  %s135_s6 = sshll.u32 %s256_s1, 4  ;;  %s136_s6 = int_to_ptr.vmem [resolvable:$true] %s135_s6 }
  0x28   :  { %v40_v5 = vld [vmem:[#allocation2] sm:$0xff]  ;;  %v171_v6 = vpack.c.bf16 %v45_v4, %v44_v2  ;;  %v41_v7 = vld [vmem:[#allocation2 + $0x8] sm:$0xff]  ;;  %s224_s7 = scalar_lea.vmem %s136_s6, 256  ;;  %p229_p3 = scmp.lt.s32.totalorder %s136_s6, %s136_s6 }
  0x29   :  { %164 = vmatprep.mubr.msk.f32.mxu0 %vm46_vm0, %v40_v5  ;;  %168 = vmatprep.subr.bf16.mxu0 %v167_v3  ;;  %p225_p2 = scmp.ne.s32.totalorder %s136_s6, %s224_s7  ;;  %p230_p4 = scmp.lt.s32.totalorder %s224_s7, %s224_s7 }
  0x2a   :  { %170 = vmatpush3.bf16.msra.mxu0 %v167_v3 }
  0x2b   :  { %172 = vmatprep.subr.bf16.mxu0 %v171_v6  ;;  %p231_p5 = por %p230_p4, %p229_p3 }
  0x2d   :  { %p232_p6 = pnand %p231_p5, %p225_p2 }
  0x2e   :  { %174 = vmatpush3.bf16.msra.mxu0 %v171_v6 }
  0x31   :  { %165 = vmatmul.mubr.msk.f32.vlgmr.msra.gmra.mrb[0].mxu0 %vm46_vm0, %v41_v7 }
 0x104   :  { %v166_v8 = vpop.f32.mrb[0].mxu0 }
 0x105   :  { %129 = vst.msk [vmem:[#allocation7 + $0x8] sm:$0xff] %vm46_vm0, %v166_v8  ;;  %v119_v9 = vpop.f32.mrb[1].mxu0 }
 0x106   :  { %128 = vst.msk [vmem:[#allocation7] sm:$0xff] %vm46_vm0, %v119_v9 }
 0x107   :  { %235 = shalt.err (!%p232_p6)
}
 0x108   :  { %s236_s10 = scalar_lea.hbm %s323_s2, 256 }
 0x109   :  { %p237_p7 = scmp.ne.s32.totalorder %s323_s2, %s236_s10  ;;  %p240_p8 = scmp.lt.u32.totalorder %s236_s10, %s323_s2 }
 0x10b   :  { %p242_p9 = pnand %p240_p8, %p237_p7 }
 0x10d   :  { %245 = shalt.err (!%p242_p9)
}
 0x10e   :  { %141 = dma.vmem_to_hbm [thread:$0]  %s136_s6, 256, %s323_s2, [#allocation4], %s253_s19, %s253_s19, %s254_s20  }
 0x10f   :  { %250 = dma.done.wait [#allocation4], 256  }
 0x110   :  { %251 = vsyncadd [#allocation4], 4294967040 }
 0x111   :  { %145 = vsyncpa [#allocation3], 1 }
 0x112   :  { %146 = vsyncpa [#allocation6], 1 }
 0x113   :  { %147 = vsyncpa [#allocation4], 1 }

</bundles_post_ra>
